<compile_context>
chip_gen: v5e
topology: v5e:2x2
jax: 0.10.0
libtpu: 0.0.40
codegen_flags: <defaults>
</compile_context>

<pallas_src>
import functools
import math

import numpy as np
import jax
import jax.numpy as jnp
from jax.experimental import pallas as pl
from jax.experimental.pallas import tpu as pltpu

# ---- model hyper-parameters (small, consistent with the module) -------------
BATCH = 2
T_SEQ = 8          # T <= max_T
MAX_T = 16         # module's max_T (only the [:T, :T] slice of the mask is used)
H_DIM = 32         # h_dim
N_HEADS = 2
HEAD_D = H_DIM // N_HEADS
MLP_DIM = 4 * H_DIM
EPS = 1e-5         # nn.LayerNorm default eps
MASK_NEG = -1e30   # finite large-negative mask value (NaN-safe vs -inf)


def _layer_norm(x, gamma, beta):
    mu = jnp.mean(x, axis=-1, keepdims=True)
    var = jnp.mean((x - mu) ** 2, axis=-1, keepdims=True)
    return (x - mu) * jax.lax.rsqrt(var + EPS) * gamma + beta


# ------------------------------- Pallas kernel --------------------------------
def block_kernel(x_ref, mask_ref,
                 wqkv_ref, bqkv_ref, wp_ref, bp_ref,
                 ln1_g_ref, ln1_b_ref,
                 w1_ref, b1_ref, w2_ref, b2_ref,
                 ln2_g_ref, ln2_b_ref,
                 o_ref, *, n_heads):
    x = x_ref[...]                               # (B*T, C) float32
    bt, c = x.shape
    d = c // n_heads
    scale = 1.0 / math.sqrt(d)

    # ---- fused QKV projection: one (B*T, C) x (C, 3C) MXU push, one bias add
    qkv = jnp.dot(x, wqkv_ref[...], preferred_element_type=jnp.float32) + bqkv_ref[...]
    q = qkv[:, 0:c]
    k = qkv[:, c:2 * c]
    v = qkv[:, 2 * c:3 * c]

    # additive block-diagonal causal bias over the flattened (B*T, B*T) scores
    mask_bias = mask_ref[...]
    wp = wp_ref[...]                              # (C, C)

    # ---- attention; per-head output folded straight into the output proj ----
    proj = jnp.zeros((bt, c), jnp.float32)
    for h in range(n_heads):                      # static loop, n_heads is tiny
        qh = q[:, h * d:(h + 1) * d]
        kh = k[:, h * d:(h + 1) * d]
        vh = v[:, h * d:(h + 1) * d]
        s = jnp.dot(qh, kh.T, preferred_element_type=jnp.float32) * scale + mask_bias
        m = jnp.max(s, axis=-1, keepdims=True)
        e = jnp.exp(s - m)
        inv = pl.reciprocal(jnp.sum(e, axis=-1, keepdims=True), approx=True)
        head = jnp.dot(e * inv, vh, preferred_element_type=jnp.float32)      # (B*T, D)
        # concat(head_0..head_{H-1}) @ Wp  ==  sum_h head_h @ Wp[h*D:(h+1)*D, :]
        proj = proj + jnp.dot(head, wp[h * d:(h + 1) * d, :],
                              preferred_element_type=jnp.float32)
    attn_out = proj + bp_ref[...]

    # ---- residual + LN1 ----
    x1 = _layer_norm(x + attn_out, ln1_g_ref[...], ln1_b_ref[...])

    # ---- MLP: Linear -> GELU(exact, erf) -> Linear, residual + LN2 ----
    h1 = jnp.dot(x1, w1_ref[...], preferred_element_type=jnp.float32) + b1_ref[...]
    h1 = 0.5 * h1 * (1.0 + jax.lax.erf(h1 * (1.0 / math.sqrt(2.0))))
    x2 = x1 + jnp.dot(h1, w2_ref[...], preferred_element_type=jnp.float32) + b2_ref[...]
    o_ref[...] = _layer_norm(x2, ln2_g_ref[...], ln2_b_ref[...])


# ------------------------------- host wrapper ---------------------------------
def _block_diag_causal_bias(batch, seq_len):
    """Additive bias: 0 where (same batch AND key<=query), MASK_NEG elsewhere."""
    tril = np.tril(np.ones((seq_len, seq_len), np.float32))
    allowed = np.kron(np.eye(batch, dtype=np.float32), tril)      # (B*T, B*T)
    return jnp.asarray(np.where(allowed > 0, 0.0, MASK_NEG).astype(np.float32))


def block_forward(x, params):
    """x: (B, T, C) float32, params: dict of kernel-layout weights."""
    B, T, C = x.shape
    x2d = x.reshape(B * T, C)

    # Fuse QKV weights/biases host-side (in a real model store them pre-fused).
    wqkv = jnp.concatenate([params["wq"], params["wk"], params["wv"]], axis=1)  # (C, 3C)
    bqkv = jnp.concatenate([params["bq"], params["bk"], params["bv"]], axis=1)  # (1, 3C)
    mask_bias = _block_diag_causal_bias(B, T)

    ordered = [
        x2d, mask_bias, wqkv, bqkv, params["wp"], params["bp"],
        params["ln1_g"], params["ln1_b"],
        params["w1"], params["b1"], params["w2"], params["b2"],
        params["ln2_g"], params["ln2_b"],
    ]

    # No grid: a single invocation; every operand is fully VMEM-resident
    # (total footprint ~70 KB, far below the VMEM limit on v5e/v6e/v7x).
    vmem_full = pl.BlockSpec(memory_space=pltpu.MemorySpace.VMEM)
    out2d = pl.pallas_call(
        functools.partial(block_kernel, n_heads=N_HEADS),
        out_shape=jax.ShapeDtypeStruct((B * T, C), jnp.float32),
        in_specs=[vmem_full] * len(ordered),
        out_specs=vmem_full,
    )(*ordered)
    return out2d.reshape(B, T, C)


# ----------------------------- reference (plain JAX) ---------------------------
def block_reference(x, params):
    C = x.shape[-1]
    D = C // N_HEADS

    def linear(v, w, b):
        return v @ w + b

    q = linear(x, params["wq"], params["bq"])
    k = linear(x, params["wk"], params["bk"])
    v = linear(x, params["wv"], params["bv"])
    B, T, _ = x.shape
    q = q.reshape(B, T, N_HEADS, D).transpose(0, 2, 1, 3)
    k = k.reshape(B, T, N_HEADS, D).transpose(0, 2, 1, 3)
    v = v.reshape(B, T, N_HEADS, D).transpose(0, 2, 1, 3)
    w = jnp.einsum("bntd,bnsd->bnts", q, k) / math.sqrt(D)
    mask = jnp.tril(jnp.ones((T, T), dtype=bool))
    w = jnp.where(mask[None, None], w, -jnp.inf)
    p = jax.nn.softmax(w, axis=-1)
    attn = jnp.einsum("bnts,bnsd->bntd", p, v)
    attn = attn.transpose(0, 2, 1, 3).reshape(B, T, C)
    attn = linear(attn, params["wp"], params["bp"])
    x1 = x + attn
    x1 = _layer_norm(x1, params["ln1_g"], params["ln1_b"])
    h1 = linear(x1, params["w1"], params["b1"])
    h1 = 0.5 * h1 * (1.0 + jax.lax.erf(h1 / math.sqrt(2.0)))
    x2 = x1 + linear(h1, params["w2"], params["b2"])
    x2 = _layer_norm(x2, params["ln2_g"], params["ln2_b"])
    return x2


# --------------------------------- main ----------------------------------------
if __name__ == "__main__":
    key = jax.random.PRNGKey(0)
    ks = jax.random.split(key, 16)

    def w_init(k, shape):
        return (0.02 * jax.random.normal(k, shape)).astype(jnp.float32)

    # weights stored kernel-layout (in, out) == PyTorch weight (out, in) transposed
    params = {
        "wq": w_init(ks[0], (H_DIM, H_DIM)), "bq": w_init(ks[1], (1, H_DIM)),
        "wk": w_init(ks[2], (H_DIM, H_DIM)), "bk": w_init(ks[3], (1, H_DIM)),
        "wv": w_init(ks[4], (H_DIM, H_DIM)), "bv": w_init(ks[5], (1, H_DIM)),
        "wp": w_init(ks[6], (H_DIM, H_DIM)), "bp": w_init(ks[7], (1, H_DIM)),
        "ln1_g": jnp.ones((1, H_DIM), jnp.float32),
        "ln1_b": jnp.zeros((1, H_DIM), jnp.float32),
        "w1": w_init(ks[8], (H_DIM, MLP_DIM)), "b1": w_init(ks[9], (1, MLP_DIM)),
        "w2": w_init(ks[10], (MLP_DIM, H_DIM)), "b2": w_init(ks[11], (1, H_DIM)),
        "ln2_g": jnp.ones((1, H_DIM), jnp.float32),
        "ln2_b": jnp.zeros((1, H_DIM), jnp.float32),
    }

    x = jax.random.normal(ks[12], (BATCH, T_SEQ, H_DIM), dtype=jnp.float32)

    out = jax.block_until_ready(block_forward(x, params))
    ref = block_reference(x, params)

    assert out.shape == (BATCH, T_SEQ, H_DIM)
    # tolerance accommodates the EUP approx-reciprocal in the softmax denominator
    assert jnp.allclose(out, ref, atol=1e-3, rtol=1e-3), "mismatch vs JAX reference"

    print("KERNEL_OK")
</pallas_src>

<mosaic_0001>
module attributes {stable_mosaic.version = 11 : i64} {
  func.func @block_kernel(%arg0: memref<16x32xf32, #tpu.memory_space<vmem>>, %arg1: memref<16x16xf32, #tpu.memory_space<vmem>>, %arg2: memref<32x96xf32, #tpu.memory_space<vmem>>, %arg3: memref<1x96xf32, #tpu.memory_space<vmem>>, %arg4: memref<32x32xf32, #tpu.memory_space<vmem>>, %arg5: memref<1x32xf32, #tpu.memory_space<vmem>>, %arg6: memref<1x32xf32, #tpu.memory_space<vmem>>, %arg7: memref<1x32xf32, #tpu.memory_space<vmem>>, %arg8: memref<32x128xf32, #tpu.memory_space<vmem>>, %arg9: memref<1x128xf32, #tpu.memory_space<vmem>>, %arg10: memref<128x32xf32, #tpu.memory_space<vmem>>, %arg11: memref<1x32xf32, #tpu.memory_space<vmem>>, %arg12: memref<1x32xf32, #tpu.memory_space<vmem>>, %arg13: memref<1x32xf32, #tpu.memory_space<vmem>>, %arg14: memref<16x32xf32, #tpu.memory_space<vmem>>) attributes {dimension_semantics = [], scalar_prefetch = 0 : i64, scratch_operands = 0 : i64, tpu.core_type = #tpu.core_type<tc>} {
    %c0 = arith.constant 0 : index
    %c0_0 = arith.constant 0 : index
    %0 = vector.load %arg0[%c0, %c0_0] : memref<16x32xf32, #tpu.memory_space<vmem>>, vector<16x32xf32>
    %c0_1 = arith.constant 0 : index
    %c0_2 = arith.constant 0 : index
    %1 = vector.load %arg2[%c0_1, %c0_2] : memref<32x96xf32, #tpu.memory_space<vmem>>, vector<32x96xf32>
    %cst = arith.constant dense<0.000000e+00> : vector<16x96xf32>
    %2 = tpu.matmul %0, %1, %cst {dimension_numbers = #tpu.dot_dimension_numbers<[1], [0], [0], [1], [0, 0, 1, 1], [], []>} : vector<16x32xf32>, vector<32x96xf32>, vector<16x96xf32> -> vector<16x96xf32>
    %c0_3 = arith.constant 0 : index
    %c0_4 = arith.constant 0 : index
    %3 = vector.load %arg3[%c0_3, %c0_4] : memref<1x96xf32, #tpu.memory_space<vmem>>, vector<1x96xf32>
    %4 = vector.broadcast %3 : vector<1x96xf32> to vector<16x96xf32>
    %5 = arith.addf %2, %4 : vector<16x96xf32>
    %6 = vector.extract_strided_slice %5 {offsets = [0, 0], sizes = [16, 32], strides = [1, 1]} : vector<16x96xf32> to vector<16x32xf32>
    %7 = vector.extract_strided_slice %5 {offsets = [0, 32], sizes = [16, 32], strides = [1, 1]} : vector<16x96xf32> to vector<16x32xf32>
    %8 = vector.extract_strided_slice %5 {offsets = [0, 64], sizes = [16, 32], strides = [1, 1]} : vector<16x96xf32> to vector<16x32xf32>
    %c0_5 = arith.constant 0 : index
    %c0_6 = arith.constant 0 : index
    %9 = vector.load %arg1[%c0_5, %c0_6] : memref<16x16xf32, #tpu.memory_space<vmem>>, vector<16x16xf32>
    %c0_7 = arith.constant 0 : index
    %c0_8 = arith.constant 0 : index
    %10 = vector.load %arg4[%c0_7, %c0_8] : memref<32x32xf32, #tpu.memory_space<vmem>>, vector<32x32xf32>
    %cst_9 = arith.constant 0.000000e+00 : f32
    %11 = vector.broadcast %cst_9 : f32 to vector<16x32xf32>
    %12 = vector.extract_strided_slice %6 {offsets = [0, 0], sizes = [16, 16], strides = [1, 1]} : vector<16x32xf32> to vector<16x16xf32>
    %13 = vector.extract_strided_slice %7 {offsets = [0, 0], sizes = [16, 16], strides = [1, 1]} : vector<16x32xf32> to vector<16x16xf32>
    %14 = vector.extract_strided_slice %8 {offsets = [0, 0], sizes = [16, 16], strides = [1, 1]} : vector<16x32xf32> to vector<16x16xf32>
    %15 = tpu.transpose %13, [1, 0] : vector<16x16xf32> -> vector<16x16xf32>
    %cst_10 = arith.constant dense<0.000000e+00> : vector<16x16xf32>
    %16 = tpu.matmul %12, %15, %cst_10 {dimension_numbers = #tpu.dot_dimension_numbers<[1], [0], [0], [1], [0, 0, 1, 1], [], []>} : vector<16x16xf32>, vector<16x16xf32>, vector<16x16xf32> -> vector<16x16xf32>
    %cst_11 = arith.constant 2.500000e-01 : f32
    %17 = vector.broadcast %cst_11 : f32 to vector<16x16xf32>
    %18 = arith.mulf %16, %17 : vector<16x16xf32>
    %19 = arith.addf %18, %9 : vector<16x16xf32>
    %cst_12 = arith.constant dense<0xFF800000> : vector<16xf32>
    %20 = vector.multi_reduction <maximumf>, %19, %cst_12 [1] : vector<16x16xf32> to vector<16xf32>
    %21 = vector.shape_cast %20 : vector<16xf32> to vector<16x1xf32>
    %22 = vector.broadcast %21 : vector<16x1xf32> to vector<16x16xf32>
    %23 = arith.subf %19, %22 : vector<16x16xf32>
    %24 = math.exp %23 : vector<16x16xf32>
    %cst_13 = arith.constant dense<0.000000e+00> : vector<16xf32>
    %25 = vector.multi_reduction <add>, %24, %cst_13 [1] : vector<16x16xf32> to vector<16xf32>
    %26 = vector.shape_cast %25 : vector<16xf32> to vector<16x1xf32>
    %27 = tpu.reciprocal %26 {approx = true} : vector<16x1xf32> -> vector<16x1xf32>
    %28 = vector.broadcast %27 : vector<16x1xf32> to vector<16x16xf32>
    %29 = arith.mulf %24, %28 : vector<16x16xf32>
    %cst_14 = arith.constant dense<0.000000e+00> : vector<16x16xf32>
    %30 = tpu.matmul %29, %14, %cst_14 {dimension_numbers = #tpu.dot_dimension_numbers<[1], [0], [0], [1], [0, 0, 1, 1], [], []>} : vector<16x16xf32>, vector<16x16xf32>, vector<16x16xf32> -> vector<16x16xf32>
    %31 = vector.extract_strided_slice %10 {offsets = [0, 0], sizes = [16, 32], strides = [1, 1]} : vector<32x32xf32> to vector<16x32xf32>
    %cst_15 = arith.constant dense<0.000000e+00> : vector<16x32xf32>
    %32 = tpu.matmul %30, %31, %cst_15 {dimension_numbers = #tpu.dot_dimension_numbers<[1], [0], [0], [1], [0, 0, 1, 1], [], []>} : vector<16x16xf32>, vector<16x32xf32>, vector<16x32xf32> -> vector<16x32xf32>
    %33 = arith.addf %11, %32 : vector<16x32xf32>
    %34 = vector.extract_strided_slice %6 {offsets = [0, 16], sizes = [16, 16], strides = [1, 1]} : vector<16x32xf32> to vector<16x16xf32>
    %35 = vector.extract_strided_slice %7 {offsets = [0, 16], sizes = [16, 16], strides = [1, 1]} : vector<16x32xf32> to vector<16x16xf32>
    %36 = vector.extract_strided_slice %8 {offsets = [0, 16], sizes = [16, 16], strides = [1, 1]} : vector<16x32xf32> to vector<16x16xf32>
    %37 = tpu.transpose %35, [1, 0] : vector<16x16xf32> -> vector<16x16xf32>
    %cst_16 = arith.constant dense<0.000000e+00> : vector<16x16xf32>
    %38 = tpu.matmul %34, %37, %cst_16 {dimension_numbers = #tpu.dot_dimension_numbers<[1], [0], [0], [1], [0, 0, 1, 1], [], []>} : vector<16x16xf32>, vector<16x16xf32>, vector<16x16xf32> -> vector<16x16xf32>
    %cst_17 = arith.constant 2.500000e-01 : f32
    %39 = vector.broadcast %cst_17 : f32 to vector<16x16xf32>
    %40 = arith.mulf %38, %39 : vector<16x16xf32>
    %41 = arith.addf %40, %9 : vector<16x16xf32>
    %cst_18 = arith.constant dense<0xFF800000> : vector<16xf32>
    %42 = vector.multi_reduction <maximumf>, %41, %cst_18 [1] : vector<16x16xf32> to vector<16xf32>
    %43 = vector.shape_cast %42 : vector<16xf32> to vector<16x1xf32>
    %44 = vector.broadcast %43 : vector<16x1xf32> to vector<16x16xf32>
    %45 = arith.subf %41, %44 : vector<16x16xf32>
    %46 = math.exp %45 : vector<16x16xf32>
    %cst_19 = arith.constant dense<0.000000e+00> : vector<16xf32>
    %47 = vector.multi_reduction <add>, %46, %cst_19 [1] : vector<16x16xf32> to vector<16xf32>
    %48 = vector.shape_cast %47 : vector<16xf32> to vector<16x1xf32>
    %49 = tpu.reciprocal %48 {approx = true} : vector<16x1xf32> -> vector<16x1xf32>
    %50 = vector.broadcast %49 : vector<16x1xf32> to vector<16x16xf32>
    %51 = arith.mulf %46, %50 : vector<16x16xf32>
    %cst_20 = arith.constant dense<0.000000e+00> : vector<16x16xf32>
    %52 = tpu.matmul %51, %36, %cst_20 {dimension_numbers = #tpu.dot_dimension_numbers<[1], [0], [0], [1], [0, 0, 1, 1], [], []>} : vector<16x16xf32>, vector<16x16xf32>, vector<16x16xf32> -> vector<16x16xf32>
    %53 = vector.extract_strided_slice %10 {offsets = [16, 0], sizes = [16, 32], strides = [1, 1]} : vector<32x32xf32> to vector<16x32xf32>
    %cst_21 = arith.constant dense<0.000000e+00> : vector<16x32xf32>
    %54 = tpu.matmul %52, %53, %cst_21 {dimension_numbers = #tpu.dot_dimension_numbers<[1], [0], [0], [1], [0, 0, 1, 1], [], []>} : vector<16x16xf32>, vector<16x32xf32>, vector<16x32xf32> -> vector<16x32xf32>
    %55 = arith.addf %33, %54 : vector<16x32xf32>
    %c0_22 = arith.constant 0 : index
    %c0_23 = arith.constant 0 : index
    %56 = vector.load %arg5[%c0_22, %c0_23] : memref<1x32xf32, #tpu.memory_space<vmem>>, vector<1x32xf32>
    %57 = vector.broadcast %56 : vector<1x32xf32> to vector<16x32xf32>
    %58 = arith.addf %55, %57 : vector<16x32xf32>
    %59 = arith.addf %0, %58 : vector<16x32xf32>
    %c0_24 = arith.constant 0 : index
    %c0_25 = arith.constant 0 : index
    %60 = vector.load %arg6[%c0_24, %c0_25] : memref<1x32xf32, #tpu.memory_space<vmem>>, vector<1x32xf32>
    %c0_26 = arith.constant 0 : index
    %c0_27 = arith.constant 0 : index
    %61 = vector.load %arg7[%c0_26, %c0_27] : memref<1x32xf32, #tpu.memory_space<vmem>>, vector<1x32xf32>
    %cst_28 = arith.constant dense<0.000000e+00> : vector<16xf32>
    %62 = vector.multi_reduction <add>, %59, %cst_28 [1] : vector<16x32xf32> to vector<16xf32>
    %63 = vector.shape_cast %62 : vector<16xf32> to vector<16x1xf32>
    %cst_29 = arith.constant 3.200000e+01 : f32
    %64 = vector.broadcast %cst_29 : f32 to vector<16x1xf32>
    %65 = arith.divf %63, %64 : vector<16x1xf32>
    %66 = vector.broadcast %65 : vector<16x1xf32> to vector<16x32xf32>
    %67 = arith.subf %59, %66 : vector<16x32xf32>
    %68 = arith.mulf %67, %67 : vector<16x32xf32>
    %cst_30 = arith.constant dense<0.000000e+00> : vector<16xf32>
    %69 = vector.multi_reduction <add>, %68, %cst_30 [1] : vector<16x32xf32> to vector<16xf32>
    %70 = vector.shape_cast %69 : vector<16xf32> to vector<16x1xf32>
    %cst_31 = arith.constant 3.200000e+01 : f32
    %71 = vector.broadcast %cst_31 : f32 to vector<16x1xf32>
    %72 = arith.divf %70, %71 : vector<16x1xf32>
    %73 = vector.broadcast %65 : vector<16x1xf32> to vector<16x32xf32>
    %74 = arith.subf %59, %73 : vector<16x32xf32>
    %cst_32 = arith.constant 9.99999974E-6 : f32
    %75 = vector.broadcast %cst_32 : f32 to vector<16x1xf32>
    %76 = arith.addf %72, %75 : vector<16x1xf32>
    %77 = math.rsqrt %76 : vector<16x1xf32>
    %78 = vector.broadcast %77 : vector<16x1xf32> to vector<16x32xf32>
    %79 = arith.mulf %74, %78 : vector<16x32xf32>
    %80 = vector.broadcast %60 : vector<1x32xf32> to vector<16x32xf32>
    %81 = arith.mulf %79, %80 : vector<16x32xf32>
    %82 = vector.broadcast %61 : vector<1x32xf32> to vector<16x32xf32>
    %83 = arith.addf %81, %82 : vector<16x32xf32>
    %c0_33 = arith.constant 0 : index
    %c0_34 = arith.constant 0 : index
    %84 = vector.load %arg8[%c0_33, %c0_34] : memref<32x128xf32, #tpu.memory_space<vmem>>, vector<32x128xf32>
    %cst_35 = arith.constant dense<0.000000e+00> : vector<16x128xf32>
    %85 = tpu.matmul %83, %84, %cst_35 {dimension_numbers = #tpu.dot_dimension_numbers<[1], [0], [0], [1], [0, 0, 1, 1], [], []>} : vector<16x32xf32>, vector<32x128xf32>, vector<16x128xf32> -> vector<16x128xf32>
    %c0_36 = arith.constant 0 : index
    %c0_37 = arith.constant 0 : index
    %86 = vector.load %arg9[%c0_36, %c0_37] : memref<1x128xf32, #tpu.memory_space<vmem>>, vector<1x128xf32>
    %87 = vector.broadcast %86 : vector<1x128xf32> to vector<16x128xf32>
    %88 = arith.addf %85, %87 : vector<16x128xf32>
    %cst_38 = arith.constant 5.000000e-01 : f32
    %89 = vector.broadcast %cst_38 : f32 to vector<16x128xf32>
    %90 = arith.mulf %89, %88 : vector<16x128xf32>
    %cst_39 = arith.constant 0.707106769 : f32
    %91 = vector.broadcast %cst_39 : f32 to vector<16x128xf32>
    %92 = arith.mulf %88, %91 : vector<16x128xf32>
    %93 = math.erf %92 : vector<16x128xf32>
    %cst_40 = arith.constant 1.000000e+00 : f32
    %94 = vector.broadcast %cst_40 : f32 to vector<16x128xf32>
    %95 = arith.addf %94, %93 : vector<16x128xf32>
    %96 = arith.mulf %90, %95 : vector<16x128xf32>
    %c0_41 = arith.constant 0 : index
    %c0_42 = arith.constant 0 : index
    %97 = vector.load %arg10[%c0_41, %c0_42] : memref<128x32xf32, #tpu.memory_space<vmem>>, vector<128x32xf32>
    %cst_43 = arith.constant dense<0.000000e+00> : vector<16x32xf32>
    %98 = tpu.matmul %96, %97, %cst_43 {dimension_numbers = #tpu.dot_dimension_numbers<[1], [0], [0], [1], [0, 0, 1, 1], [], []>} : vector<16x128xf32>, vector<128x32xf32>, vector<16x32xf32> -> vector<16x32xf32>
    %99 = arith.addf %83, %98 : vector<16x32xf32>
    %c0_44 = arith.constant 0 : index
    %c0_45 = arith.constant 0 : index
    %100 = vector.load %arg11[%c0_44, %c0_45] : memref<1x32xf32, #tpu.memory_space<vmem>>, vector<1x32xf32>
    %101 = vector.broadcast %100 : vector<1x32xf32> to vector<16x32xf32>
    %102 = arith.addf %99, %101 : vector<16x32xf32>
    %c0_46 = arith.constant 0 : index
    %c0_47 = arith.constant 0 : index
    %103 = vector.load %arg12[%c0_46, %c0_47] : memref<1x32xf32, #tpu.memory_space<vmem>>, vector<1x32xf32>
    %c0_48 = arith.constant 0 : index
    %c0_49 = arith.constant 0 : index
    %104 = vector.load %arg13[%c0_48, %c0_49] : memref<1x32xf32, #tpu.memory_space<vmem>>, vector<1x32xf32>
    %cst_50 = arith.constant dense<0.000000e+00> : vector<16xf32>
    %105 = vector.multi_reduction <add>, %102, %cst_50 [1] : vector<16x32xf32> to vector<16xf32>
    %106 = vector.shape_cast %105 : vector<16xf32> to vector<16x1xf32>
    %cst_51 = arith.constant 3.200000e+01 : f32
    %107 = vector.broadcast %cst_51 : f32 to vector<16x1xf32>
    %108 = arith.divf %106, %107 : vector<16x1xf32>
    %109 = vector.broadcast %108 : vector<16x1xf32> to vector<16x32xf32>
    %110 = arith.subf %102, %109 : vector<16x32xf32>
    %111 = arith.mulf %110, %110 : vector<16x32xf32>
    %cst_52 = arith.constant dense<0.000000e+00> : vector<16xf32>
    %112 = vector.multi_reduction <add>, %111, %cst_52 [1] : vector<16x32xf32> to vector<16xf32>
    %113 = vector.shape_cast %112 : vector<16xf32> to vector<16x1xf32>
    %cst_53 = arith.constant 3.200000e+01 : f32
    %114 = vector.broadcast %cst_53 : f32 to vector<16x1xf32>
    %115 = arith.divf %113, %114 : vector<16x1xf32>
    %116 = vector.broadcast %108 : vector<16x1xf32> to vector<16x32xf32>
    %117 = arith.subf %102, %116 : vector<16x32xf32>
    %cst_54 = arith.constant 9.99999974E-6 : f32
    %118 = vector.broadcast %cst_54 : f32 to vector<16x1xf32>
    %119 = arith.addf %115, %118 : vector<16x1xf32>
    %120 = math.rsqrt %119 : vector<16x1xf32>
    %121 = vector.broadcast %120 : vector<16x1xf32> to vector<16x32xf32>
    %122 = arith.mulf %117, %121 : vector<16x32xf32>
    %123 = vector.broadcast %103 : vector<1x32xf32> to vector<16x32xf32>
    %124 = arith.mulf %122, %123 : vector<16x32xf32>
    %125 = vector.broadcast %104 : vector<1x32xf32> to vector<16x32xf32>
    %126 = arith.addf %124, %125 : vector<16x32xf32>
    %c0_55 = arith.constant 0 : index
    %c0_56 = arith.constant 0 : index
    %127 = vector.load %arg14[%c0_55, %c0_56] : memref<16x32xf32, #tpu.memory_space<vmem>>, vector<16x32xf32>
    tpu.vector_store %arg14[%c0_55, %c0_56], %126 {strides = array<i32>} : memref<16x32xf32, #tpu.memory_space<vmem>>, vector<16x32xf32>,
    return
  }
}

</mosaic_0001>

<bundles_post_ra>
// kernel: tpu_custom_call.1
= control target key start
LH: loop header
LB: loop body
LE: loop exit
PB: predicated region body
PF: predicated region fallthrough
CT: control target
= control target key end

     0   :  { %s1068_s0 = inlined_call_operand.vmem [shape: f32[16,32], index: 0, kind: input, shape index: {}]   ;;  %s1069_s1 = inlined_call_operand.vmem [shape: f32[16,16], index: 1, kind: input, shape index: {}]   ;;  %s1070_s2 = inlined_call_operand.vmem [shape: f32[32,96], index: 2, kind: input, shape index: {}]   ;;  %s1071_s3 = inlined_call_operand.vmem [shape: f32[1,96], index: 3, kind: input, shape index: {}]   ;;  %s1072_s4 = inlined_call_operand.vmem [shape: f32[32,32], index: 4, kind: input, shape index: {}]   ;;  %s1073_s5 = inlined_call_operand.vmem [shape: f32[1,32], index: 5, kind: input, shape index: {}]   ;;  %s1074_s6 = inlined_call_operand.vmem [shape: f32[1,32], index: 6, kind: input, shape index: {}]   ;;  %s1075_s7 = inlined_call_operand.vmem [shape: f32[1,32], index: 7, kind: input, shape index: {}]   ;;  %s1076_s8 = inlined_call_operand.vmem [shape: f32[32,128], index: 8, kind: input, shape index: {}]   ;;  %s1077_s9 = inlined_call_operand.vmem [shape: f32[1,128], index: 9, kind: input, shape index: {}]   ;;  %s1078_s10 = inlined_call_operand.vmem [shape: f32[128,32], index: 10, kind: input, shape index: {}]   ;;  %s1079_s11 = inlined_call_operand.vmem [shape: f32[1,32], index: 11, kind: input, shape index: {}]   ;;  %s1080_s12 = inlined_call_operand.vmem [shape: f32[1,32], index: 12, kind: input, shape index: {}]   ;;  %s1081_s13 = inlined_call_operand.vmem [shape: f32[1,32], index: 13, kind: input, shape index: {}]   ;;  %s1082_s14 = inlined_call_operand.hbm [shape: f32[16,32], index: 14, kind: output, shape index: {}]  }
   0x1   :  { %v53_v0 = vld [vmem:[%s1070_s2 + $0x18] sm:$0xff]  ;;  %v52_v1 = vld [vmem:[%s1070_s2 + $0x10] sm:$0xff]  ;;  %v51_v2 = vld [vmem:[%s1070_s2 + $0x8] sm:$0xff] }
   0x2   :  { %77 = vmatpush.msra.mxu0 %v53_v0  ;;  %692 = vmatpush.msra.mxu1 %v53_v0  ;;  %v50_v3 = vld [vmem:[%s1070_s2] sm:$0xff] }
   0x4   :  { %78 = vmatpush.msra.mxu0 %v52_v1  ;;  %693 = vmatpush.msra.mxu1 %v52_v1 }
   0x5   :  { %19 = vsyncpa [#allocation3], 0  ;;  %v878_v4 = vld [vmem:[%s1068_s0] sm:$0xff]  ;;  %vm58_vm0 = vcmask 261120   ;;  %v883_v5 = vld [vmem:[%s1068_s0 + $0x8] sm:$0xff]  ;;  %s779_s26 = smov 112  }
   0x6   :  { %79 = vmatpush.msra.mxu0 %v51_v2  ;;  %694 = vmatpush.msra.mxu1 %v51_v2  ;;  %v715_v6 = vld [vmem:[%s1071_s3] ss:$0 sm:$0xff]  ;;  %s780_s0 = smov 80   ;;  %s781_s27 = smov 96   ;;  %vm100_vm1 = vcmask 130048   ;;  %v89_v29 = vld [vmem:[%s1069_s1 + $0x8] sm:$0xff] }
   0x7   :  { %v88_v18 = vld [vmem:[%s1069_s1] sm:$0xff]  ;;  %s782_s15 = smov 48   ;;  %s783_s1 = smov 64  }
   0x8   :  { %80 = vmatpush.msra.mxu0 %v50_v3  ;;  %695 = vmatpush.msra.mxu1 %v50_v3  ;;  %s787_s25 = smov 8  }
   0x9   :  { %670 = vmatmul.msk.f32.vlgmr.msra.gmra.mxu0 %vm58_vm0, %v878_v4  ;;  %671 = vmatmul.msk.f32.vlgmr.msra.gmra.mxu1 %vm58_vm0, %v883_v5 }
  0x86   :  { %v82_v7 = vpop.f32.mrf.mxu0  ;;  %v85_v8 = vpop.f32.mrf.mxu1 }
  0x87   :  { %v83_v9 = vadd.f32 %v715_v6, %v82_v7  ;;  %v86_v10 = vadd.f32 %v715_v6, %v85_v8 }
  0x89   :  { %195 = vrot.lane.b32.xlu2 %v86_v10, %s779_s26  ;;  %199 = vrot.lane.b32.xlu0 %v86_v10, %s780_s0  ;;  %v705_v35 = vpack.i.bf16 %v83_v9, %v86_v10 }
  0x8a   :  { %193 = vrot.lane.b32.xlu1 %v83_v9, %s779_s26 }
  0x91   :  { %96 = vrot.lane.b32.xlu2 %v83_v9, %s781_s27  ;;  %197 = vrot.lane.b32.xlu0 %v83_v9, %s780_s0 }
  0x92   :  { %98 = vrot.lane.b32.xlu1 %v86_v10, %s781_s27 }
  0xe3   :  { %v196_v13 = vpop.permute.xlu2 %195 }
  0xeb   :  { %v97_v16 = vpop.permute.xlu2 %96 }
  0xfb   :  { %v200_v11 = vpop.permute.xlu0 %199 }
  0xfc   :  { %v194_v12 = vpop.permute.xlu1 %193  ;;  %678 = vmatpush.xpose.msk.msra.mxu3 %vm100_vm1, %v200_v11 }
 0x103   :  { %v198_v14 = vpop.permute.xlu0 %197 }
 0x104   :  { %v99_v15 = vpop.permute.xlu1 %98  ;;  %679 = vmatpush.xpose.msk.msra.mxu3 %vm100_vm1, %v198_v14  ;;  %v91_v14 = vld [vmem:[%s1072_s4 + $0x8] sm:$0xff] }
 0x105   :  { %672 = vmatpush.xpose.msk.msrb.mxu1 %vm100_vm1, %v99_v15  ;;  %v90_v15 = vld [vmem:[%s1072_s4] sm:$0xff] }
 0x107   :  { %680 = vmatmul.msk.f32.vlgmr.msra.gmra.mxu3 %vm100_vm1, %v194_v12 }
 0x109   :  { %673 = vmatpush.xpose.msk.msrb.mxu1 %vm100_vm1, %v97_v16 }
 0x10c   :  { %674 = vmatmul.msk.f32.vlgmr.msrb.gmra.mxu1 %vm100_vm1, %v83_v9 }
 0x10d   :  { %342 = vmatpush.msra.mxu1 %v91_v14 }
 0x10f   :  { %681 = vmatmul.msk.f32.gmra.mxu3 %vm100_vm1, %v196_v13  ;;  %v92_v13 = vld [vmem:[%s1072_s4 + $0x10] sm:$0xff]  ;;  %343 = vmatpush.msra.mxu1 %v90_v15 }
 0x114   :  { %675 = vmatmul.msk.f32.gmra.mxu1 %vm100_vm1, %v86_v10  ;;  %v93_v10 = vld [vmem:[%s1072_s4 + $0x18] sm:$0xff] }
 0x189   :  { %v126_v17 = vpop.f32.mrf.mxu1 }
 0x18a   :  { %v132_v19 = vmul.f32 0.25, %v126_v17  ;;  %v226_v20 = vpop.f32.mrf.mxu3 }
 0x18b   :  { %v232_v21 = vmul.f32 0.25, %v226_v20 }
 0x18c   :  { %v134_v22 = vadd.f32 %v132_v19, %v88_v18 }
 0x18d   :  { %v234_v23 = vadd.f32 %v232_v21, %v88_v18  ;;  %v716_v21 = vld [vmem:[%s1073_s5] ss:$0 sm:$0xff]  ;;  %s658_s5 = sshll.u32 %s1082_s14, 4  ;;  %s659_s5 = int_to_ptr.hbm [resolvable:$true] %s658_s5 }
 0x18e   :  { %v136_v24 = vsel %vm100_vm1, %v134_v22, -inf }
 0x18f   :  { %137 = vmax.xlane.f32.xlu1 %v136_v24  ;;  %v236_v25 = vsel %vm100_vm1, %v234_v23, -inf }
 0x190   :  { %237 = vmax.xlane.f32.xlu0 %v236_v25 }
 0x191   :  { %v129_v28 = vpop.f32.mrf.mxu1 }
 0x192   :  { %v229_v26 = vpop.f32.mrf.mxu3  ;;  %v133_v31 = vmul.f32 0.25, %v129_v28 }
 0x193   :  { %v233_v27 = vmul.f32 0.25, %v229_v26 }
 0x194   :  { %v135_v33 = vadd.f32 %v133_v31, %v89_v29 }
 0x195   :  { %v235_v30 = vadd.f32 %v233_v27, %v89_v29 }
 0x196   :  { %v139_v34 = vsel %vm100_vm1, %v135_v33, -inf }
 0x197   :  { %v239_v32 = vsel %vm100_vm1, %v235_v30, -inf }
 0x198   :  { %240 = vmax.xlane.f32.xlu2 %v239_v32 }
 0x1a0   :  { %140 = vmax.xlane.f32.xlu2 %v139_v34 }
 0x1b8   :  { %706 = vrot.lane.b32.xlu2 %v705_v35, %s782_s15 }
 0x202   :  { %v138_v36 = vpop.xlane.xlu1 %137 }
 0x203   :  { %v142_v37 = vsub.f32 %v134_v22, %v138_v36  ;;  %v238_v38 = vpop.xlane.xlu0 %237 }
 0x204   :  { %v242_v39 = vsub.f32 %v234_v23, %v238_v38 }
 0x205   :  { %v144_v40 = vmul.f32 1.442695, %v142_v37 }
 0x206   :  { %v244_v41 = vmul.f32 1.442695, %v242_v39 }
 0x207   :  { %723 = vpow2.f32 %v144_v40 }
 0x208   :  { %725 = vpow2.f32 %v244_v41 }
 0x20b   :  { %v241_v42 = vpop.xlane.xlu2 %240 }
 0x20c   :  { %v243_v43 = vsub.f32 %v235_v30, %v241_v42 }
 0x20d   :  { %v724_v44 = vpop.eup %723 }
 0x20e   :  { %v726_v45 = vpop.eup %725  ;;  %v246_v46 = vmul.f32 1.442695, %v243_v43  ;;  %v148_v47 = vsel %vm100_vm1, %v724_v44, 0.0 }
 0x20f   :  { %149 = vadd.xlane.f32.xlu1 %v148_v47  ;;  %v248_v48 = vsel %vm100_vm1, %v726_v45, 0.0 }
 0x210   :  { %727 = vpow2.f32 %v246_v46  ;;  %249 = vadd.xlane.f32.xlu0 %v248_v48  ;;  %v425_v48 = vld [vmem:[%s1076_s8 + $0x18] sm:$0xff] }
 0x211   :  { %448 = vmatpush.msrb.mxu3 %v425_v48 }
 0x213   :  { %v141_v49 = vpop.xlane.xlu2 %140 }
 0x214   :  { %v143_v50 = vsub.f32 %v135_v33, %v141_v49  ;;  %v784_v33 = vmov 32.0   ;;  %v424_v49 = vld [vmem:[%s1076_s8 + $0x10] sm:$0xff] }
 0x215   :  { %449 = vmatpush.msrb.mxu3 %v424_v49 }
 0x216   :  { %v728_v51 = vpop.eup %727  ;;  %v146_v52 = vmul.f32 1.442695, %v143_v50  ;;  %v423_v50 = vld [vmem:[%s1076_s8 + $0x8] sm:$0xff] }
 0x217   :  { %v251_v53 = vsel %vm100_vm1, %v728_v51, 0.0  ;;  %450 = vmatpush.msrb.mxu3 %v423_v50 }
 0x218   :  { %729 = vpow2.f32 %v146_v52  ;;  %252 = vadd.xlane.f32.xlu0 %v251_v53 }
 0x21b   :  { %v707_v54 = vpop.permute.xlu2 %706 }
 0x21c   :  { %v708_v55 = vunpack.i.l.bf16 %v707_v54  ;;  %v709_v57 = vunpack.i.h.bf16 %v707_v54 }
 0x21e   :  { %v730_v56 = vpop.eup %729  ;;  %284 = vmatpush.msra.mxu2 %v708_v55 }
 0x21f   :  { %v151_v58 = vsel %vm100_vm1, %v730_v56, 0.0 }
 0x220   :  { %152 = vadd.xlane.f32.xlu0 %v151_v58  ;;  %285 = vmatpush.msra.mxu2 %v709_v57 }
 0x228   :  { %711 = vrot.lane.b32.xlu1 %v705_v35, %s783_s1 }
 0x282   :  { %v150_v0 = vpop.xlane.xlu1 %149 }
 0x283   :  { %v250_v59 = vpop.xlane.xlu0 %249 }
 0x284   :  { %731 = vrcp.f32 %v250_v59 }
 0x28a   :  { %v732_v60 = vpop.eup %731 }
 0x28b   :  { %v253_v61 = vpop.xlane.xlu0 %252  ;;  %v256_v62 = vmul.f32 %v732_v60, %v726_v45 }
 0x28c   :  { %733 = vrcp.f32 %v253_v61 }
 0x28d   :  { %682 = vmatmul.msk.f32.vlgmr.msra.gmra.mxu2 %vm100_vm1, %v256_v62  ;;  %735 = vrcp.f32 %v150_v0 }
 0x292   :  { %v734_v63 = vpop.eup %733 }
 0x293   :  { %v257_v1 = vmul.f32 %v734_v63, %v728_v51  ;;  %v153_v2 = vpop.xlane.xlu0 %152  ;;  %v736_v6 = vpop.eup %735  ;;  %v422_v51 = vld [vmem:[%s1076_s8] sm:$0xff] }
 0x294   :  { %737 = vrcp.f32 %v153_v2  ;;  %v156_v9 = vmul.f32 %v736_v6, %v724_v44  ;;  %451 = vmatpush.msrb.mxu3 %v422_v51  ;;  %v717_v2 = vld [vmem:[%s1074_s6] ss:$0 sm:$0xff]  ;;  %v548_v51 = vld [vmem:[%s1078_s10 + $0x8] sm:$0xff] }
 0x295   :  { %683 = vmatmul.msk.f32.gmra.mxu2 %vm100_vm1, %v257_v1  ;;  %739 = vrcp.f32 %v784_v33 }
 0x29a   :  { %v712_v3 = vpop.permute.xlu1 %711  ;;  %v738_v11 = vpop.eup %737 }
 0x29b   :  { %v713_v7 = vunpack.i.l.bf16 %v712_v3  ;;  %v714_v8 = vunpack.i.h.bf16 %v712_v3  ;;  %v157_v12 = vmul.f32 %v738_v11, %v730_v56  ;;  %v740_v34 = vpop.eup %739 }
 0x29c   :  { %v368_v35 = vmul.f32 32.0, %v740_v34  ;;  %vm372_vm2 = vweird.f32 %v740_v34 }
 0x29d   :  { %184 = vmatpush.msrb.mxu0 %v713_v7 }
 0x29e   :  { %v369_v36 = vsub.f32 1.0, %v368_v35 }
 0x29f   :  { %185 = vmatpush.msrb.mxu0 %v714_v8  ;;  %v718_v8 = vld [vmem:[%s1075_s7] ss:$0 sm:$0xff] }
 0x2a0   :  { %676 = vmatmul.msk.f32.vlgmr.msrb.gmra.mxu0 %vm100_vm1, %v156_v9  ;;  %v370_v37 = vmul.f32 %v740_v34, %v369_v36 }
 0x2a1   :  { %313 = vmatpush.msra.mxu0 %v93_v10 }
 0x2a2   :  { %v371_v38 = vadd.f32 %v740_v34, %v370_v37  ;;  %v553_v37 = vld [vmem:[%s1078_s10 + $0x30] sm:$0xff] }
 0x2a3   :  { %314 = vmatpush.msra.mxu0 %v92_v13 }
 0x2a8   :  { %677 = vmatmul.msk.f32.gmra.mxu0 %vm100_vm1, %v157_v12 }
 0x310   :  { %v287_v16 = vpop.f32.mrf.mxu2 }
 0x311   :  { %684 = vmatmul.msk.f32.vlgmr.msra.gmra.mxu0 %vm100_vm1, %v287_v16 }
 0x318   :  { %v290_v17 = vpop.f32.mrf.mxu2 }
 0x319   :  { %685 = vmatmul.msk.f32.gmra.mxu0 %vm100_vm1, %v290_v17 }
 0x31d   :  { %v187_v18 = vpop.f32.mrf.mxu0 }
 0x31e   :  { %686 = vmatmul.msk.f32.vlgmr.msra.gmra.mxu1 %vm100_vm1, %v187_v18  ;;  %v562_v18 = vld [vmem:[%s1078_s10 + $0x78] sm:$0xff] }
 0x31f   :  { %563 = vmatpush.msrb.mxu2 %v562_v18 }
 0x325   :  { %v190_v19 = vpop.f32.mrf.mxu0 }
 0x326   :  { %687 = vmatmul.msk.f32.gmra.mxu1 %vm100_vm1, %v190_v19  ;;  %v561_v19 = vld [vmem:[%s1078_s10 + $0x70] sm:$0xff] }
 0x327   :  { %564 = vmatpush.msrb.mxu2 %v561_v19 }
 0x38e   :  { %v316_v20 = vpop.f32.mrf.mxu0 }
 0x396   :  { %v319_v27 = vpop.f32.mrf.mxu0 }
 0x39b   :  { %v345_v22 = vpop.f32.mrf.mxu1 }
 0x39c   :  { %v346_v23 = vadd.f32 %v345_v22, %v316_v20  ;;  %v560_v20 = vld [vmem:[%s1078_s10 + $0x68] sm:$0xff]  ;;  %v559_v22 = vld [vmem:[%s1078_s10 + $0x60] sm:$0xff] }
 0x39d   :  { %565 = vmatpush.msrb.mxu2 %v560_v20 }
 0x39e   :  { %v355_v24 = vadd.f32 %v716_v21, %v346_v23  ;;  %v558_v23 = vld [vmem:[%s1078_s10 + $0x58] sm:$0xff] }
 0x39f   :  { %566 = vmatpush.msrb.mxu2 %v559_v22 }
 0x3a0   :  { %v357_v25 = vadd.f32 %v355_v24, %v878_v4  ;;  %v941_v4 = vsel %vm372_vm2, %v740_v34, %v371_v38 }
 0x3a1   :  { %567 = vmatpush.msrb.mxu2 %v558_v23 }
 0x3a2   :  { %v361_v26 = vsel %vm58_vm0, %v357_v25, 0.0 }
 0x3a3   :  { %v348_v28 = vpop.f32.mrf.mxu1  ;;  %362 = vadd.xlane.f32.xlu0 %v361_v26  ;;  %v557_v26 = vld [vmem:[%s1078_s10 + $0x50] sm:$0xff] }
 0x3a4   :  { %v349_v29 = vadd.f32 %v348_v28, %v319_v27  ;;  %568 = vmatpush.msrb.mxu2 %v557_v26  ;;  %v556_v28 = vld [vmem:[%s1078_s10 + $0x48] sm:$0xff] }
 0x3a6   :  { %v356_v30 = vadd.f32 %v716_v21, %v349_v29  ;;  %v719_v21 = vld [vmem:[%s1077_s9] ss:$0 sm:$0xff]  ;;  %569 = vmatpush.msrb.mxu2 %v556_v28 }
 0x3a8   :  { %v358_v31 = vadd.f32 %v356_v30, %v883_v5  ;;  %v555_v30 = vld [vmem:[%s1078_s10 + $0x40] sm:$0xff] }
 0x3a9   :  { %570 = vmatpush.msrb.mxu2 %v555_v30 }
 0x3aa   :  { %v364_v32 = vsel %vm58_vm0, %v358_v31, 0.0 }
 0x3ab   :  { %365 = vadd.xlane.f32.xlu2 %v364_v32  ;;  %v554_v32 = vld [vmem:[%s1078_s10 + $0x38] sm:$0xff] }
 0x3ac   :  { %571 = vmatpush.msrb.mxu2 %v554_v32 }
 0x3ae   :  { %572 = vmatpush.msrb.mxu2 %v553_v37 }
 0x416   :  { %v363_v39 = vpop.xlane.xlu0 %362 }
 0x417   :  { %v374_v40 = vmul.f32 %v941_v4, %v363_v39 }
 0x419   :  { %v376_v41 = vsub.f32 %v357_v25, %v374_v40  ;;  %v552_v40 = vld [vmem:[%s1078_s10 + $0x28] sm:$0xff] }
 0x41a   :  { %573 = vmatpush.msrb.mxu2 %v552_v40 }
 0x41b   :  { %v378_v42 = vmul.f32 %v376_v41, %v376_v41 }
 0x41d   :  { %v380_v5 = vsel %vm58_vm0, %v378_v42, 0.0 }
 0x41e   :  { %381 = vadd.xlane.f32.xlu0 %v380_v5  ;;  %v366_v43 = vpop.xlane.xlu2 %365 }
 0x41f   :  { %v375_v44 = vmul.f32 %v941_v4, %v366_v43  ;;  %v551_v43 = vld [vmem:[%s1078_s10 + $0x20] sm:$0xff] }
 0x420   :  { %574 = vmatpush.msrb.mxu2 %v551_v43 }
 0x421   :  { %v377_v45 = vsub.f32 %v358_v31, %v375_v44 }
 0x423   :  { %v379_v46 = vmul.f32 %v377_v45, %v377_v45 }
 0x425   :  { %v383_v47 = vsel %vm58_vm0, %v379_v46, 0.0 }
 0x426   :  { %384 = vadd.xlane.f32.xlu1 %v383_v47  ;;  %v549_v47 = vld [vmem:[%s1078_s10 + $0x10] sm:$0xff] }
 0x491   :  { %v382_v52 = vpop.xlane.xlu0 %381 }
 0x492   :  { %v386_v53 = vmul.f32 %v382_v52, %v941_v4 }
 0x494   :  { %v388_v54 = vadd.f32 1e-05, %v386_v53 }
 0x496   :  { %741 = vrsqrt.f32 %v388_v54  ;;  %vm396_vm4 = vweird.f32 %v388_v54 }
 0x499   :  { %v385_v55 = vpop.xlane.xlu1 %384 }
 0x49a   :  { %v387_v56 = vmul.f32 %v385_v55, %v941_v4  ;;  %v547_v55 = vld [vmem:[%s1078_s10] sm:$0xff] }
 0x49c   :  { %v742_v57 = vpop.eup %741  ;;  %v389_v58 = vadd.f32 1e-05, %v387_v56 }
 0x49d   :  { %v391_v59 = vmul.f32 %v742_v57, %v388_v54  ;;  %vm397_vm3 = vweird.f32 %v742_v57 }
 0x49e   :  { %743 = vrsqrt.f32 %v389_v58  ;;  %vm398_vm5 = vmor %vm396_vm4, %vm397_vm3  ;;  %vm406_vm7 = vweird.f32 %v389_v58 }
 0x49f   :  { %v392_v60 = vmul.f32 %v742_v57, %v391_v59 }
 0x4a1   :  { %v393_v61 = vmul.f32 0.5, %v392_v60 }
 0x4a3   :  { %v394_v62 = vsub.f32 1.5, %v393_v61 }
 0x4a4   :  { %v744_v63 = vpop.eup %743 }
 0x4a5   :  { %v395_v0 = vmul.f32 %v742_v57, %v394_v62  ;;  %v401_v1 = vmul.f32 %v744_v63, %v389_v58  ;;  %vm407_vm6 = vweird.f32 %v744_v63 }
 0x4a6   :  { %vm408_vm8 = vmor %vm406_vm7, %vm407_vm6 }
 0x4a7   :  { %v399_v3 = vsel %vm398_vm5, %v742_v57, %v395_v0  ;;  %v402_v6 = vmul.f32 %v744_v63, %v401_v1 }
 0x4a8   :  { %v410_v7 = vmul.f32 %v399_v3, %v376_v41 }
 0x4a9   :  { %v403_v9 = vmul.f32 0.5, %v402_v6 }
 0x4aa   :  { %v415_v10 = vmul.f32 %v717_v2, %v410_v7 }
 0x4ab   :  { %v404_v11 = vsub.f32 1.5, %v403_v9 }
 0x4ac   :  { %v967_v12 = vadd.f32 %v718_v8, %v415_v10 }
 0x4ad   :  { %v405_v13 = vmul.f32 %v744_v63, %v404_v11 }
 0x4ae   :  { %688 = vmatmul.msk.f32.vlgmr.msrb.gmra.mxu3 %vm58_vm0, %v967_v12 }
 0x4af   :  { %v409_v14 = vsel %vm408_vm8, %v744_v63, %v405_v13 }
 0x4b0   :  { %v411_v15 = vmul.f32 %v409_v14, %v377_v45  ;;  %v550_v45 = vld [vmem:[%s1078_s10 + $0x18] sm:$0xff] }
 0x4b1   :  { %575 = vmatpush.msrb.mxu2 %v550_v45 }
 0x4b2   :  { %v416_v16 = vmul.f32 %v717_v2, %v411_v15 }
 0x4b3   :  { %576 = vmatpush.msrb.mxu2 %v549_v47 }
 0x4b4   :  { %v971_v17 = vadd.f32 %v718_v8, %v416_v16 }
 0x4b5   :  { %577 = vmatpush.msrb.mxu2 %v548_v51 }
 0x4b6   :  { %689 = vmatmul.msk.f32.gmra.mxu3 %vm58_vm0, %v971_v17 }
 0x4b7   :  { %578 = vmatpush.msrb.mxu2 %v547_v55 }
 0x531   :  { %v453_v24 = vpop.f32.mrf.mxu3 }
 0x532   :  { %v993_v25 = vadd.f32 %v719_v21, %v453_v24 }
 0x534   :  { %v999_v27 = vmul.f32 0.70710677, %v993_v25 }
 0x536   :  { %v463_v29 = vmul.f32 %v999_v27, %v999_v27 }
 0x538   :  { %v464_v31 = vmin.f32 %v463_v29, 16.0 }
 0x539   :  { %v456_v33 = vpop.f32.mrf.mxu3 }
 0x53a   :  { %v465_v34 = vmul.f32 2.1237322e-06, %v464_v31  ;;  %v476_v35 = vmul.f32 3.8918573e-05, %v464_v31  ;;  %v1012_v36 = vadd.f32 %v719_v21, %v456_v33 }
 0x53c   :  { %v466_v38 = vadd.f32 0.00028619796, %v465_v34  ;;  %v477_v39 = vadd.f32 0.001143296, %v476_v35  ;;  %v1021_v41 = vmul.f32 0.70710677, %v1012_v36 }
 0x53d   :  { %v460_v55 = vmul.f32 0.5, %v1012_v36 }
 0x53e   :  { %v467_v42 = vmul.f32 %v466_v38, %v464_v31  ;;  %v478_v5 = vmul.f32 %v477_v39, %v464_v31  ;;  %v503_v44 = vmul.f32 %v1021_v41, %v1021_v41 }
 0x540   :  { %v479_v46 = vadd.f32 0.014752088, %v478_v5  ;;  %v468_v48 = vadd.f32 0.0036580483, %v467_v42  ;;  %v504_v49 = vmin.f32 %v503_v44, 16.0 }
 0x542   :  { %v480_v50 = vmul.f32 %v479_v46, %v464_v31  ;;  %v505_v52 = vmul.f32 2.1237322e-06, %v504_v49  ;;  %v516_v53 = vmul.f32 3.8918573e-05, %v504_v49  ;;  %v469_v56 = vmul.f32 %v468_v48, %v464_v31 }
 0x543   :  { %v459_v46 = vmul.f32 0.5, %v993_v25  ;;  %v720_v25 = vld [vmem:[%s1079_s11] ss:$0 sm:$0xff] }
 0x544   :  { %v481_v54 = vadd.f32 0.112945676, %v480_v50  ;;  %v506_v57 = vadd.f32 0.00028619796, %v505_v52  ;;  %v517_v58 = vadd.f32 0.001143296, %v516_v53 }
 0x545   :  { %v470_v63 = vadd.f32 0.05243302, %v469_v56 }
 0x546   :  { %v482_v59 = vmul.f32 %v481_v54, %v464_v31  ;;  %v507_v60 = vmul.f32 %v506_v57, %v504_v49  ;;  %v518_v61 = vmul.f32 %v517_v58, %v504_v49 }
 0x547   :  { %v471_v7 = vmul.f32 %v470_v63, %v464_v31 }
 0x548   :  { %v483_v62 = vadd.f32 0.4994258, %v482_v59  ;;  %v519_v0 = vadd.f32 0.014752088, %v518_v61  ;;  %v508_v2 = vadd.f32 0.0036580483, %v507_v60 }
 0x549   :  { %v472_v11 = vadd.f32 0.18741608, %v471_v7 }
 0x54a   :  { %v484_v1 = vmul.f32 %v483_v62, %v464_v31  ;;  %v520_v3 = vmul.f32 %v519_v0, %v504_v49  ;;  %v509_v9 = vmul.f32 %v508_v2, %v504_v49 }
 0x54b   :  { %v473_v18 = vmul.f32 %v472_v11, %v464_v31 }
 0x54c   :  { %v485_v6 = vadd.f32 1.0, %v484_v1  ;;  %v521_v8 = vadd.f32 0.112945676, %v520_v3  ;;  %v510_v14 = vadd.f32 0.05243302, %v509_v9 }
 0x54d   :  { %v474_v24 = vadd.f32 1.1283791, %v473_v18 }
 0x54e   :  { %745 = vrcp.f32 %v485_v6  ;;  %v522_v10 = vmul.f32 %v521_v8, %v504_v49  ;;  %v511_v21 = vmul.f32 %v510_v14, %v504_v49  ;;  %v497_v23 = vand.u32 2147483648, %v485_v6 }
 0x54f   :  { %v495_v28 = vand.u32 2147483647, %v485_v6  ;;  %vm491_vm10 = vweird.f32 %v485_v6  ;;  %v475_v34 = vmul.f32 %v474_v24, %v999_v27 }
 0x550   :  { %v523_v13 = vadd.f32 0.4994258, %v522_v10  ;;  %v512_v29 = vadd.f32 0.18741608, %v511_v21  ;;  %v498_v32 = vor.u32 1.1754944e-38, %v497_v23 }
 0x551   :  { %vm496_vm12 = vcmp.eq.f32.partialorder %v495_v28, 8.507059e+37 }
 0x552   :  { %v524_v15 = vmul.f32 %v523_v13, %v504_v49  ;;  %v513_v37 = vmul.f32 %v512_v29, %v504_v49 }
 0x554   :  { %v746_v16 = vpop.eup %745  ;;  %v525_v20 = vadd.f32 1.0, %v524_v15  ;;  %v514_v43 = vadd.f32 1.1283791, %v513_v37 }
 0x555   :  { %v487_v19 = vmul.f32 %v746_v16, %v485_v6  ;;  %vm492_vm9 = vweird.f32 %v746_v16 }
 0x556   :  { %747 = vrcp.f32 %v525_v20  ;;  %vm493_vm11 = vmor %vm491_vm10, %vm492_vm9  ;;  %v537_v5 = vand.u32 2147483648, %v525_v20  ;;  %v535_v45 = vand.u32 2147483647, %v525_v20  ;;  %vm531_vm14 = vweird.f32 %v525_v20 }
 0x557   :  { %v488_v22 = vsub.f32 1.0, %v487_v19  ;;  %v515_v51 = vmul.f32 %v514_v43, %v1021_v41 }
 0x558   :  { %v538_v27 = vor.u32 1.1754944e-38, %v537_v5  ;;  %vm536_vm1 = vcmp.eq.f32.partialorder %v535_v45, 8.507059e+37 }
 0x559   :  { %v489_v26 = vmul.f32 %v746_v16, %v488_v22 }
 0x55b   :  { %v490_v30 = vadd.f32 %v746_v16, %v489_v26  ;;  %v721_v26 = vld [vmem:[%s1080_s12] ss:$0 sm:$0xff]  ;;  %s785_s12 = smov [#allocation2]  }
 0x55c   :  { %v748_v33 = vpop.eup %747  ;;  %s656_s2 = sshll.u32 %s785_s12, 4  ;;  %s657_s2 = int_to_ptr.vmem [resolvable:$true] %s656_s2 }
 0x55d   :  { %v494_v35 = vsel %vm493_vm11, %v746_v16, %v490_v30  ;;  %v527_v38 = vmul.f32 %v748_v33, %v525_v20  ;;  %vm532_vm13 = vweird.f32 %v748_v33 }
 0x55e   :  { %v499_v31 = vsel %vm496_vm12, %v498_v32, %v494_v35  ;;  %vm533_vm15 = vmor %vm531_vm14, %vm532_vm13  ;;  %v722_v32 = vld [vmem:[%s1081_s13] ss:$0 sm:$0xff]  ;;  %s786_s13 = smov 128  }
 0x55f   :  { %v500_v39 = vmul.f32 %v499_v31, %v475_v34  ;;  %v528_v40 = vsub.f32 1.0, %v527_v38 }
 0x561   :  { %v690_v42 = vclamps-f32 %v500_v39, 1.0  ;;  %v529_v44 = vmul.f32 %v748_v33, %v528_v40 }
 0x563   :  { %v543_v47 = vadd.f32 1.0, %v690_v42  ;;  %v530_v48 = vadd.f32 %v748_v33, %v529_v44 }
 0x565   :  { %v545_v50 = vmul.f32 %v543_v47, %v459_v46  ;;  %v534_v49 = vsel %vm533_vm15, %v748_v33, %v530_v48 }
 0x566   :  { %v539_v52 = vsel %vm536_vm1, %v538_v27, %v534_v49 }
 0x567   :  { %579 = vmatmul.f32.vlgmr.msrb.gmra.mxu2 %v545_v50  ;;  %v540_v53 = vmul.f32 %v539_v52, %v515_v51 }
 0x569   :  { %v691_v54 = vclamps-f32 %v540_v53, 1.0 }
 0x56b   :  { %v544_v56 = vadd.f32 1.0, %v691_v54 }
 0x56d   :  { %v546_v57 = vmul.f32 %v544_v56, %v460_v55 }
 0x56f   :  { %582 = vmatmul.f32.gmra.mxu2 %v546_v57 }
 0x5ea   :  { %v580_v58 = vpop.f32.mrf.mxu2 }
 0x5eb   :  { %v586_v59 = vadd.f32 %v580_v58, %v967_v12 }
 0x5ed   :  { %v592_v60 = vadd.f32 %v720_v25, %v586_v59 }
 0x5ef   :  { %v596_v41 = vsel %vm58_vm0, %v592_v60, 0.0 }
 0x5f0   :  { %597 = vadd.xlane.f32.xlu0 %v596_v41 }
 0x5f2   :  { %v583_v61 = vpop.f32.mrf.mxu2 }
 0x5f3   :  { %v587_v62 = vadd.f32 %v583_v61, %v971_v17 }
 0x5f5   :  { %v593_v63 = vadd.f32 %v720_v25, %v587_v62 }
 0x5f7   :  { %v599_v36 = vsel %vm58_vm0, %v593_v63, 0.0 }
 0x5f8   :  { %600 = vadd.xlane.f32.xlu0 %v599_v36 }
 0x663   :  { %v598_v0 = vpop.xlane.xlu0 %597 }
 0x664   :  { %v602_v1 = vmul.f32 %v598_v0, %v941_v4 }
 0x666   :  { %v604_v2 = vsub.f32 %v592_v60, %v602_v1 }
 0x668   :  { %v606_v3 = vmul.f32 %v604_v2, %v604_v2 }
 0x66a   :  { %v608_v6 = vsel %vm58_vm0, %v606_v3, 0.0 }
 0x66b   :  { %609 = vadd.xlane.f32.xlu0 %v608_v6  ;;  %v601_v12 = vpop.xlane.xlu0 %600 }
 0x66c   :  { %v603_v7 = vmul.f32 %v601_v12, %v941_v4 }
 0x66e   :  { %v605_v8 = vsub.f32 %v593_v63, %v603_v7 }
 0x670   :  { %v607_v9 = vmul.f32 %v605_v8, %v605_v8 }
 0x672   :  { %v611_v10 = vsel %vm58_vm0, %v607_v9, 0.0 }
 0x673   :  { %612 = vadd.xlane.f32.xlu0 %v611_v10 }
 0x6de   :  { %v610_v17 = vpop.xlane.xlu0 %609 }
 0x6df   :  { %v614_v11 = vmul.f32 %v610_v17, %v941_v4 }
 0x6e1   :  { %v616_v13 = vadd.f32 1e-05, %v614_v11 }
 0x6e3   :  { %749 = vrsqrt.f32 %v616_v13  ;;  %vm624_vm3 = vweird.f32 %v616_v13 }
 0x6e6   :  { %v613_v14 = vpop.xlane.xlu0 %612 }
 0x6e7   :  { %v615_v15 = vmul.f32 %v613_v14, %v941_v4 }
 0x6e9   :  { %v750_v16 = vpop.eup %749  ;;  %v617_v19 = vadd.f32 1e-05, %v615_v15 }
 0x6ea   :  { %v619_v18 = vmul.f32 %v750_v16, %v616_v13  ;;  %vm625_vm2 = vweird.f32 %v750_v16 }
 0x6eb   :  { %751 = vrsqrt.f32 %v617_v19  ;;  %vm626_vm4 = vmor %vm624_vm3, %vm625_vm2  ;;  %vm634_vm6 = vweird.f32 %v617_v19 }
 0x6ec   :  { %v620_v20 = vmul.f32 %v750_v16, %v619_v18 }
 0x6ee   :  { %v621_v21 = vmul.f32 0.5, %v620_v20 }
 0x6f0   :  { %v622_v22 = vsub.f32 1.5, %v621_v21 }
 0x6f1   :  { %v752_v23 = vpop.eup %751 }
 0x6f2   :  { %v623_v24 = vmul.f32 %v750_v16, %v622_v22  ;;  %v629_v28 = vmul.f32 %v752_v23, %v617_v19  ;;  %vm635_vm5 = vweird.f32 %v752_v23 }
 0x6f3   :  { %vm636_vm7 = vmor %vm634_vm6, %vm635_vm5 }
 0x6f4   :  { %v627_v29 = vsel %vm626_vm4, %v750_v16, %v623_v24  ;;  %v630_v4 = vmul.f32 %v752_v23, %v629_v28 }
 0x6f5   :  { %v638_v30 = vmul.f32 %v627_v29, %v604_v2 }
 0x6f6   :  { %v631_v34 = vmul.f32 0.5, %v630_v4 }
 0x6f7   :  { %v643_v33 = vmul.f32 %v721_v26, %v638_v30 }
 0x6f8   :  { %v632_v35 = vsub.f32 1.5, %v631_v34 }
 0x6f9   :  { %v648_v31 = vadd.f32 %v722_v32, %v643_v33 }
 0x6fa   :  { %v633_v37 = vmul.f32 %v752_v23, %v632_v35 }
 0x6fb   :  { %650 = vst.msk [vmem:[#allocation2] sm:$0xff] %vm58_vm0, %v648_v31 }
 0x6fc   :  { %v637_v38 = vsel %vm636_vm7, %v752_v23, %v633_v37 }
 0x6fd   :  { %v639_v39 = vmul.f32 %v637_v38, %v605_v8 }
 0x6ff   :  { %v644_v40 = vmul.f32 %v721_v26, %v639_v39 }
 0x701   :  { %v649_v42 = vadd.f32 %v722_v32, %v644_v40 }
 0x703   :  { %651 = vst.msk [vmem:[#allocation2 + $0x8] sm:$0xff] %vm58_vm0, %v649_v42 }
 0x704   :  { %664 = dma.vmem_to_hbm [thread:$0]  %s657_s2, 256, %s659_s5, [#allocation3], %s786_s13, %s786_s13, %s787_s25  }
 0x705   :  { %777 = dma.done.wait [#allocation3], 256  }
 0x706   :  { %778 = vsyncadd [#allocation3], 4294967040 }
 0x707   :  { %669 = vsyncpa [#allocation3], 1 }

</bundles_post_ra>
